<compile_context>
chip_gen: v7x
topology: tpu7x:2x2x1
jax: 0.10.0
libtpu: 0.0.40
codegen_flags: <defaults>
</compile_context>

<pallas_src>
import jax
import jax.numpy as jnp
from jax.experimental import pallas as pl
from jax.experimental.pallas import tpu as pltpu

C_OUT = 16  # conv out_channels, fixed by the module


def _round_up(a, b):
    return ((a + b - 1) // b) * b


def _cdiv(a, b):
    return -(-a // b)


def _regression_cnn2_kernel(x_ref, wconv_ref, cb_ref, w1_ref, b1_ref,
                            w2_ref, b2_ref, out_ref):
    """One batch tile of the full forward pass.

    x_ref    : (tn, k*feature)            f32/bf16 VMEM (x flattened row-major)
    wconv_ref: (k*feature, 16*feature)    bf16 VMEM (banded conv weight, pad folded in)
    cb_ref   : (1, 16*feature)            f32 VMEM  (conv bias repeated per column)
    w1_ref   : (16*feature, 16)           bf16 VMEM (fc1 weight, W1^T)
    b1_ref   : (1, 16)                    f32 VMEM
    w2_ref   : (1, 16)                    f32 VMEM  (fc2 weight row)
    b2_ref   : (1, 1)                     f32 VMEM
    out_ref  : (1, 1, tn)                 f32 VMEM  (lane-dense, transposed)
    """
    # Conv2d(1, 16, (k, 3), padding=(0, 1)) + bias + ReLU as a single MXU matmul.
    xb = x_ref[...].astype(jnp.bfloat16)                         # (tn, k*f)
    flat = jnp.dot(xb, wconv_ref[...],
                   preferred_element_type=jnp.float32)           # (tn, 16*f)
    flat = jnp.maximum(flat + cb_ref[...], 0.0)

    # fc1: Linear(16*feature, 16) + ReLU
    z1 = jnp.dot(flat.astype(jnp.bfloat16), w1_ref[...],
                 preferred_element_type=jnp.float32) + b1_ref[...]
    z1 = jnp.maximum(z1, 0.0)                                    # (tn, 16)

    # fc2: Linear(16, 1), computed as (1,16) . (tn,16)^T so the batch dim
    # lands on the lane axis -> lane-dense unmasked store.
    z2 = jax.lax.dot_general(
        w2_ref[...], z1,
        dimension_numbers=(((1,), (1,)), ((), ())),
        preferred_element_type=jnp.float32) + b2_ref[...]        # (1, tn)
    out_ref[...] = z2[None]                                      # (1, 1, tn)


def build_conv_matrix(conv_w, k, feature):
    """Scatter conv taps into a banded (k*feature, 16*feature) matrix.

    W_conv[i*feature + u, c*feature + w] = conv_w[c, i, j] where u = w + j - 1,
    with the width zero-padding (padding=(0,1)) realized by band truncation.
    """
    # Shifted identities per tap j (shift = 1 - j): eye(f, f, k=s)[u, u+s] = 1.
    s = jnp.stack([jnp.eye(feature, feature, k=1 - j, dtype=conv_w.dtype)
                   for j in range(3)], axis=0)                   # (3, f, f)
    w = jnp.einsum('cij,juw->iucw', conv_w, s)                   # (k, f, C, f)
    return w.reshape(k * feature, C_OUT * feature)


def prepare_params(params, *, k, feature):
    """One-time host-side weight repacking for the kernel."""
    conv_w, conv_b, fc1_w_t, fc1_b, fc2_w, fc2_b = params
    wconv = build_conv_matrix(conv_w, k, feature).astype(jnp.bfloat16)
    cb_row = jnp.repeat(conv_b, feature)[None, :].astype(jnp.float32)
    return (wconv, cb_row,
            fc1_w_t.astype(jnp.bfloat16),
            fc1_b.astype(jnp.float32),
            fc2_w.astype(jnp.float32),
            fc2_b.astype(jnp.float32))


def regression_cnn2_forward(x, prepared, *, k, feature, tile_n=1024):
    """x: (N, 1, k, feature), f32 or (preferably, if free upstream) bf16.

    No standalone cast or pad pass is added: x is reshaped (a view) and
    streamed once; a ragged last batch tile is handled by Pallas block
    clamping and sliced off after the call.
    """
    wconv, cb_row, w1, b1, w2, b2 = prepared
    n = x.shape[0]
    kf = k * feature
    cf = C_OUT * feature

    # (N, 1, k, feature) -> (N, k*feature): contiguous view, no padding pass.
    x2d = x.reshape(n, kf)

    # Batch tiling: big tiles for DMA efficiency / per-step overhead,
    # clamped for tiny batches.
    tn = min(tile_n, _round_up(n, 8))
    # Keep the "parallel" grid >= 2 steps for mid-size batches so both v7x
    # TensorCores get work (no-op on single-TC v5e/v6e).
    if n >= 256:
        tn = min(tn, _round_up(_cdiv(n, 2), 128))
    num_tiles = _cdiv(n, tn)   # ragged last tile: Pallas clamps the input DMA

    # Explicit VMEM budget: single-buffered weights + double-buffered x tile
    # + the (tn, 16*feature) f32 conv/ReLU temporary and bf16 casts.
    weight_bytes = (wconv.size * wconv.dtype.itemsize
                    + cb_row.size * cb_row.dtype.itemsize
                    + w1.size * w1.dtype.itemsize
                    + b1.size * 4 + w2.size * 4 + b2.size * 4)
    x_bytes = 2 * tn * kf * x2d.dtype.itemsize
    tmp_bytes = tn * cf * 4 + tn * cf * 2 + tn * kf * 2
    out_bytes = 2 * tn * 4
    vmem_limit = int(min(64 << 20,
                         max(16 << 20,
                             1.5 * (weight_bytes + x_bytes + tmp_bytes
                                    + out_bytes))))

    # Constant index_map -> a single resident VMEM copy (no double buffer).
    resident = pl.Buffered(1)

    out = pl.pallas_call(
        _regression_cnn2_kernel,
        out_shape=jax.ShapeDtypeStruct((num_tiles, 1, tn), jnp.float32),
        grid=(num_tiles,),
        in_specs=[
            pl.BlockSpec((tn, kf), lambda i: (i, 0)),     # x tile (double-buffered)
            pl.BlockSpec((kf, cf), lambda i: (0, 0),      # banded conv weight
                         pipeline_mode=resident),
            pl.BlockSpec((1, cf), lambda i: (0, 0),       # conv bias row
                         pipeline_mode=resident),
            pl.BlockSpec((cf, 16), lambda i: (0, 0),      # fc1 W^T
                         pipeline_mode=resident),
            pl.BlockSpec((1, 16), lambda i: (0, 0),       # fc1 b
                         pipeline_mode=resident),
            pl.BlockSpec((1, 16), lambda i: (0, 0),       # fc2 W row
                         pipeline_mode=resident),
            pl.BlockSpec((1, 1), lambda i: (0, 0),        # fc2 b
                         pipeline_mode=resident),
        ],
        out_specs=pl.BlockSpec((1, 1, tn), lambda i: (i, 0, 0)),
        compiler_params=pltpu.CompilerParams(
            dimension_semantics=("parallel",),
            vmem_limit_bytes=vmem_limit),
    )(x2d, wconv, cb_row, w1, b1, w2, b2)

    # (num_tiles, 1, tn) lane-dense slab -> (N,); ragged-tile garbage sliced off.
    return out.reshape(-1)[:n]


def make_params(key, *, k, feature):
    """Deterministic synthetic parameters with the module's shapes."""
    ks = jax.random.split(key, 6)
    in_fc1 = C_OUT * feature
    conv_w = jax.random.normal(ks[0], (C_OUT, k, 3), jnp.float32) * 0.2
    conv_b = jax.random.normal(ks[1], (C_OUT,), jnp.float32) * 0.1
    # PyTorch Linear stores W as (out, in); we keep W^T = (in, out) directly.
    fc1_w_t = jax.random.normal(ks[2], (in_fc1, 16), jnp.float32) * 0.1
    fc1_b = jax.random.normal(ks[3], (1, 16), jnp.float32) * 0.1
    fc2_w = jax.random.normal(ks[4], (1, 16), jnp.float32) * 0.1   # row of W2
    fc2_b = jax.random.normal(ks[5], (1, 1), jnp.float32) * 0.1
    return conv_w, conv_b, fc1_w_t, fc1_b, fc2_w, fc2_b


def reference_forward(x, params, *, k, feature):
    """Pure-JAX f32 reference mirroring the PyTorch forward, for validation."""
    conv_w, conv_b, fc1_w_t, fc1_b, fc2_w, fc2_b = params
    n = x.shape[0]
    xp = jnp.pad(x[:, 0, :, :], ((0, 0), (0, 0), (1, 1)))
    conv = jnp.zeros((n, C_OUT, feature), jnp.float32)
    for c in range(C_OUT):
        for i in range(k):
            for j in range(3):
                conv = conv.at[:, c, :].add(xp[:, i, j:j + feature] * conv_w[c, i, j])
    conv = jax.nn.relu(conv + conv_b[None, :, None])
    flat = conv.reshape(n, -1)                    # (N, 16*feature), c*feature+w
    z1 = jax.nn.relu(flat @ fc1_w_t + fc1_b)
    z2 = jnp.sum(z1 * fc2_w, axis=1, keepdims=True) + fc2_b
    return z2[:, 0]


if __name__ == "__main__":
    FEATURE = 16
    K = 4
    BATCH = 8

    key = jax.random.PRNGKey(0)
    k_x, k_p = jax.random.split(key)
    x = jax.random.normal(k_x, (BATCH, 1, K, FEATURE), jnp.float32)
    params = make_params(k_p, k=K, feature=FEATURE)
    prepared = prepare_params(params, k=K, feature=FEATURE)

    out = regression_cnn2_forward(x, prepared, k=K, feature=FEATURE)
    out = jax.block_until_ready(out)

    ref = reference_forward(x, params, k=K, feature=FEATURE)
    assert out.shape == (BATCH,)
    # Tolerance accounts for bf16 MXU inputs (accumulation stays f32).
    assert jnp.allclose(out, ref, atol=5e-2, rtol=5e-2), (out, ref)

    print("KERNEL_OK")
</pallas_src>

<mosaic_0001>
module attributes {stable_mosaic.version = 11 : i64} {
  func.func @_regression_cnn2_kernel(%arg0: i32, %arg1: memref<8x64xf32, #tpu.memory_space<vmem>>, %arg2: memref<64x256xbf16, #tpu.memory_space<vmem>>, %arg3: memref<1x256xf32, #tpu.memory_space<vmem>>, %arg4: memref<256x16xbf16, #tpu.memory_space<vmem>>, %arg5: memref<1x16xf32, #tpu.memory_space<vmem>>, %arg6: memref<1x16xf32, #tpu.memory_space<vmem>>, %arg7: memref<1x1xf32, #tpu.memory_space<vmem>>, %arg8: memref<1x1x8xf32, #tpu.memory_space<vmem>>) attributes {dimension_semantics = [#tpu.dimension_semantics<parallel>], iteration_bounds = array<i64: 1>, scalar_prefetch = 0 : i64, scratch_operands = 0 : i64, tpu.core_type = #tpu.core_type<tc>, window_params = [{transform_indices = @transform_0, window_bounds = array<i64: 8, 64>}, {pipeline_mode = #tpu.pipeline_mode<synchronous>, transform_indices = @transform_1, window_bounds = array<i64: 64, 256>}, {pipeline_mode = #tpu.pipeline_mode<synchronous>, transform_indices = @transform_2, window_bounds = array<i64: 1, 256>}, {pipeline_mode = #tpu.pipeline_mode<synchronous>, transform_indices = @transform_3, window_bounds = array<i64: 256, 16>}, {pipeline_mode = #tpu.pipeline_mode<synchronous>, transform_indices = @transform_4, window_bounds = array<i64: 1, 16>}, {pipeline_mode = #tpu.pipeline_mode<synchronous>, transform_indices = @transform_5, window_bounds = array<i64: 1, 16>}, {pipeline_mode = #tpu.pipeline_mode<synchronous>, transform_indices = @transform_6, window_bounds = array<i64: 1, 1>}, {transform_indices = @transform_7, window_bounds = array<i64: 1, 1, 8>}]} {
    %c0 = arith.constant 0 : index
    %c0_0 = arith.constant 0 : index
    %0 = vector.load %arg1[%c0, %c0_0] : memref<8x64xf32, #tpu.memory_space<vmem>>, vector<8x64xf32>
    %1 = arith.truncf %0 : vector<8x64xf32> to vector<8x64xbf16>
    %c0_1 = arith.constant 0 : index
    %c0_2 = arith.constant 0 : index
    %2 = vector.load %arg2[%c0_1, %c0_2] : memref<64x256xbf16, #tpu.memory_space<vmem>>, vector<64x256xbf16>
    %cst = arith.constant dense<0.000000e+00> : vector<8x256xf32>
    %3 = tpu.matmul %1, %2, %cst {dimension_numbers = #tpu.dot_dimension_numbers<[1], [0], [0], [1], [0, 0, 1, 1], [], []>} : vector<8x64xbf16>, vector<64x256xbf16>, vector<8x256xf32> -> vector<8x256xf32>
    %c0_3 = arith.constant 0 : index
    %c0_4 = arith.constant 0 : index
    %4 = vector.load %arg3[%c0_3, %c0_4] : memref<1x256xf32, #tpu.memory_space<vmem>>, vector<1x256xf32>
    %5 = vector.broadcast %4 : vector<1x256xf32> to vector<8x256xf32>
    %6 = arith.addf %3, %5 : vector<8x256xf32>
    %cst_5 = arith.constant 0.000000e+00 : f32
    %7 = vector.broadcast %cst_5 : f32 to vector<8x256xf32>
    %8 = arith.maximumf %6, %7 : vector<8x256xf32>
    %9 = arith.truncf %8 : vector<8x256xf32> to vector<8x256xbf16>
    %c0_6 = arith.constant 0 : index
    %c0_7 = arith.constant 0 : index
    %10 = vector.load %arg4[%c0_6, %c0_7] : memref<256x16xbf16, #tpu.memory_space<vmem>>, vector<256x16xbf16>
    %cst_8 = arith.constant dense<0.000000e+00> : vector<8x16xf32>
    %11 = tpu.matmul %9, %10, %cst_8 {dimension_numbers = #tpu.dot_dimension_numbers<[1], [0], [0], [1], [0, 0, 1, 1], [], []>} : vector<8x256xbf16>, vector<256x16xbf16>, vector<8x16xf32> -> vector<8x16xf32>
    %c0_9 = arith.constant 0 : index
    %c0_10 = arith.constant 0 : index
    %12 = vector.load %arg5[%c0_9, %c0_10] : memref<1x16xf32, #tpu.memory_space<vmem>>, vector<1x16xf32>
    %13 = vector.broadcast %12 : vector<1x16xf32> to vector<8x16xf32>
    %14 = arith.addf %11, %13 : vector<8x16xf32>
    %cst_11 = arith.constant 0.000000e+00 : f32
    %15 = vector.broadcast %cst_11 : f32 to vector<8x16xf32>
    %16 = arith.maximumf %14, %15 : vector<8x16xf32>
    %c0_12 = arith.constant 0 : index
    %c0_13 = arith.constant 0 : index
    %17 = vector.load %arg6[%c0_12, %c0_13] : memref<1x16xf32, #tpu.memory_space<vmem>>, vector<1x16xf32>
    %cst_14 = arith.constant dense<0.000000e+00> : vector<1x8xf32>
    %18 = tpu.matmul %17, %16, %cst_14 {dimension_numbers = #tpu.dot_dimension_numbers<[1], [1], [0], [0], [0, 0, 1, 0], [], []>} : vector<1x16xf32>, vector<8x16xf32>, vector<1x8xf32> -> vector<1x8xf32>
    %c0_15 = arith.constant 0 : index
    %c0_16 = arith.constant 0 : index
    %19 = vector.load %arg7[%c0_15, %c0_16] : memref<1x1xf32, #tpu.memory_space<vmem>>, vector<1x1xf32>
    %20 = vector.broadcast %19 : vector<1x1xf32> to vector<1x8xf32>
    %21 = arith.addf %18, %20 : vector<1x8xf32>
    %22 = vector.shape_cast %21 : vector<1x8xf32> to vector<1x1x8xf32>
    %c0_17 = arith.constant 0 : index
    %c0_18 = arith.constant 0 : index
    %c0_19 = arith.constant 0 : index
    %23 = vector.load %arg8[%c0_17, %c0_18, %c0_19] : memref<1x1x8xf32, #tpu.memory_space<vmem>>, vector<1x1x8xf32>
    tpu.vector_store %arg8[%c0_17, %c0_18, %c0_19], %22 {strides = array<i32>} : memref<1x1x8xf32, #tpu.memory_space<vmem>>, vector<1x1x8xf32>,
    return
  }
  func.func @transform_0(%arg0: i32) -> (i32, i32) {
    %c0_i32 = arith.constant 0 : i32
    %c0_i32_0 = arith.constant 0 : i32
    return %arg0, %c0_i32 : i32, i32
  }
  func.func @transform_1(%arg0: i32) -> (i32, i32) {
    %c0_i32 = arith.constant 0 : i32
    %c0_i32_0 = arith.constant 0 : i32
    %c0_i32_1 = arith.constant 0 : i32
    return %c0_i32, %c0_i32_0 : i32, i32
  }
  func.func @transform_2(%arg0: i32) -> (i32, i32) {
    %c0_i32 = arith.constant 0 : i32
    %c0_i32_0 = arith.constant 0 : i32
    %c0_i32_1 = arith.constant 0 : i32
    return %c0_i32, %c0_i32_0 : i32, i32
  }
  func.func @transform_3(%arg0: i32) -> (i32, i32) {
    %c0_i32 = arith.constant 0 : i32
    %c0_i32_0 = arith.constant 0 : i32
    %c0_i32_1 = arith.constant 0 : i32
    return %c0_i32, %c0_i32_0 : i32, i32
  }
  func.func @transform_4(%arg0: i32) -> (i32, i32) {
    %c0_i32 = arith.constant 0 : i32
    %c0_i32_0 = arith.constant 0 : i32
    %c0_i32_1 = arith.constant 0 : i32
    return %c0_i32, %c0_i32_0 : i32, i32
  }
  func.func @transform_5(%arg0: i32) -> (i32, i32) {
    %c0_i32 = arith.constant 0 : i32
    %c0_i32_0 = arith.constant 0 : i32
    %c0_i32_1 = arith.constant 0 : i32
    return %c0_i32, %c0_i32_0 : i32, i32
  }
  func.func @transform_6(%arg0: i32) -> (i32, i32) {
    %c0_i32 = arith.constant 0 : i32
    %c0_i32_0 = arith.constant 0 : i32
    %c0_i32_1 = arith.constant 0 : i32
    return %c0_i32, %c0_i32_0 : i32, i32
  }
  func.func @transform_7(%arg0: i32) -> (i32, i32, i32) {
    %c0_i32 = arith.constant 0 : i32
    %c0_i32_0 = arith.constant 0 : i32
    %c0_i32_1 = arith.constant 0 : i32
    return %arg0, %c0_i32, %c0_i32_0 : i32, i32, i32
  }
}

</mosaic_0001>

<bundles_post_ra>
// kernel: tpu_custom_call.1
= control target key start
LH: loop header
LB: loop body
LE: loop exit
PB: predicated region body
PF: predicated region fallthrough
CT: control target
= control target key end

     0   :  { %s678_s0 = inlined_call_operand.vmem [shape: f32[8,64], index: 0, kind: input, shape index: {}]   ;;  %s679_s1 = inlined_call_operand.vmem [shape: bf16[64,256], index: 1, kind: input, shape index: {}]   ;;  %s680_s2 = inlined_call_operand.vmem [shape: f32[1,256], index: 2, kind: input, shape index: {}]   ;;  %s681_s3 = inlined_call_operand.vmem [shape: bf16[256,16], index: 3, kind: input, shape index: {}]   ;;  %s682_s4 = inlined_call_operand.vmem [shape: f32[1,16], index: 4, kind: input, shape index: {}]   ;;  %s683_s5 = inlined_call_operand.vmem [shape: f32[1,16], index: 5, kind: input, shape index: {}]   ;;  %s684_s6 = inlined_call_operand.<no memory space> [shape: f32[1,1], index: 6, kind: input, shape index: {}]   ;;  %s685_s7 = inlined_call_operand.hbm [shape: f32[1,1,8], index: 7, kind: output, shape index: {}]  }
   0x1   :  { %v12_v0 = vstv %s684_s6 }
   0x2   :  { %13 = vst [vmem:[#allocation2] sm:$0x1] %v12_v0 }
   0x3   :  { %v483_v1 = vld [vmem:[%s679_s1 + $0x4] ss:$8 sps:$4 sm:$0xff]   ;;  %v485_v2 = vld [vmem:[%s679_s1] ss:$8 sps:$4 sm:$0xff]   ;;  %v535_v3 = vmov 0   ;;  %v499_v14 = vld [vmem:[%s681_s3 + $0x50] sm:$0xff]  }
   0x4   :  { %128 = vmatprep.mubr.bf16.mxu0 %v535_v3  ;;  %482 = vset.pattern.permute.xlu0 %v535_v3  ;;  %v486_v4 = vld [vmem:[%s679_s1 + $0x14] ss:$8 sps:$4 sm:$0xff]   ;;  %v488_v5 = vld [vmem:[%s679_s1 + $0x10] ss:$8 sps:$4 sm:$0xff]   ;;  %v489_v6 = vld [vmem:[%s679_s1 + $0x24] ss:$8 sps:$4 sm:$0xff]  }
   0x5   :  { %96 = vmatprep.subr.bf16.mxu0 %v483_v1  ;;  %v491_v7 = vld [vmem:[%s679_s1 + $0x20] ss:$8 sps:$4 sm:$0xff]   ;;  %v492_v8 = vld [vmem:[%s679_s1 + $0x34] ss:$8 sps:$4 sm:$0xff]   ;;  %v494_v12 = vld [vmem:[%s679_s1 + $0x30] ss:$8 sps:$4 sm:$0xff]  }
   0x6   :  { %97 = vmatpush1.bf16.msra.mxu0 %v485_v2  ;;  %v495_v9 = vld [vmem:[%s681_s3 + $0x40] sm:$0xff]   ;;  %v497_v11 = vld [vmem:[%s681_s3 + $0x48] sm:$0xff]   ;;  %v500_v16 = vld [vmem:[%s681_s3 + $0x10] sm:$0xff]   ;;  %vm92_vm0 = vcmask 523264  }
   0x7   :  { %98 = vmatprep.subr.bf16.mxu0 %v486_v4  ;;  %v496_v10 = vld [vmem:[%s681_s3] sm:$0xff]   ;;  %449 = vmatprep.subr.bf16.mxu1 %v495_v9  ;;  %v498_v13 = vld [vmem:[%s681_s3 + $0x8] sm:$0xff]   ;;  %v501_v18 = vld [vmem:[%s681_s3 + $0x58] sm:$0xff]  }
   0x8   :  { %450 = vmatpush3.bf16.msra.mxu1 %v496_v10  ;;  %v30_v15 = vld [vmem:[%s678_s0] sm:$0xff]  ;;  %v502_v19 = vld [vmem:[%s681_s3 + $0x18] sm:$0xff]  }
   0x9   :  { %451 = vmatprep.subr.bf16.mxu1 %v497_v11  ;;  %v31_v17 = vpack.c.bf16 %v30_v15, %v30_v15  ;;  %v503_v20 = vld [vmem:[%s681_s3 + $0x60] sm:$0xff]  }
   0xa   :  { %99 = vmatpush1.bf16.msra.mxu0 %v488_v5 }
   0xb   :  { %100 = vmatprep.subr.bf16.mxu0 %v489_v6 }
   0xc   :  { %452 = vmatpush3.bf16.msra.mxu1 %v498_v13 }
   0xd   :  { %453 = vmatprep.subr.bf16.mxu1 %v499_v14 }
   0xe   :  { %101 = vmatpush1.bf16.msra.mxu0 %v491_v7 }
   0xf   :  { %102 = vmatprep.subr.bf16.mxu0 %v492_v8 }
  0x10   :  { %454 = vmatpush3.bf16.msra.mxu1 %v500_v16 }
  0x11   :  { %455 = vmatprep.subr.bf16.mxu1 %v501_v18 }
  0x12   :  { %103 = vmatpush1.bf16.msra.mxu0 %v494_v12 }
  0x15   :  { %429 = vmatmul.mubr.msk.bf16.vlgmr.msra.gmra.mrb[0].mxu0 %vm92_vm0, %v31_v17 }
  0x16   :  { %14 = vsyncpa [#allocation4], 0  ;;  %456 = vmatpush3.bf16.msra.mxu1 %v502_v19  ;;  %v504_v21 = vld [vmem:[%s681_s3 + $0x20] sm:$0xff]   ;;  %v505_v22 = vld [vmem:[%s681_s3 + $0x68] sm:$0xff]   ;;  %v42_v28 = vlaneseq  ;;  %v536_v45 = vmov 0.0   ;;  %vm537_vm1 = vmmov 0  }
  0x17   :  { %457 = vmatprep.subr.bf16.mxu1 %v503_v20  ;;  %v506_v23 = vld [vmem:[%s681_s3 + $0x28] sm:$0xff]   ;;  %v507_v24 = vld [vmem:[%s681_s3 + $0x70] sm:$0xff]   ;;  %v509_v26 = vld [vmem:[%s681_s3 + $0x78] sm:$0xff]   ;;  %473 = vmatprep.subr.mxu0 %v536_v45  ;;  %vm328_vm2 = vcmask 130048   ;;  %s538_s30 = smov [#allocation3]   ;;  %vm405_vm3 = vcmask 57344  }
  0x18   :  { %v508_v25 = vld [vmem:[%s681_s3 + $0x30] sm:$0xff]   ;;  %v510_v27 = vld [vmem:[%s681_s3 + $0x38] sm:$0xff]   ;;  %v43_v29 = vshrl.u32 %v42_v28, 7  ;;  %v40_v31 = vld [vmem:[%s680_s2] sm:$0x3]  ;;  %475 = vmatprep.mubr.msk.f32.mxu0 %vm537_vm1, %v536_v45  ;;  %s413_s8 = sshll.u32 %s538_s30, 4  ;;  %s414_s8 = int_to_ptr.vmem [resolvable:$true] %s413_s8 }
  0x19   :  { %v318_v46 = vld [vmem:[#allocation2] sm:$0x1]  ;;  %s515_s1 = scalar_lea.vmem %s414_s8, 32  ;;  %p516_p1 = scmp.lt.s32.totalorder %s414_s8, %s414_s8 }
  0x1a   :  { %458 = vmatpush3.bf16.msra.mxu1 %v504_v21  ;;  %v44_v30 = vsub.s32 0, %v43_v29  ;;  %v48_v32 = vsub.s32 1, %v43_v29  ;;  %321 = vperm.xlu0 %482, %v318_v46   ;;  %v430_v48 = vld [vmem:[%s682_s4] ss:$0 sm:$0xff]  ;;  %s511_s4 = scalar_lea.vmem %s414_s8, 16 }
  0x1b   :  { %459 = vmatprep.subr.bf16.mxu1 %v505_v22  ;;  %v317_v55 = vld [vmem:[%s683_s5] sm:$0x1]  ;;  %p512_p0 = scmp.ne.s32.totalorder %s414_s8, %s511_s4  ;;  %p517_p2 = scmp.lt.s32.totalorder %s515_s1, %s511_s4 }
  0x1c   :  { %v45_v33 = vrot.slane %v40_v31, %v44_v30  ;;  %v49_v34 = vrot.slane %v40_v31, %v48_v32 }
  0x1d   :  { %p518_p3 = por %p517_p2, %p516_p1 }
  0x1e   :  { %460 = vmatpush3.bf16.msra.mxu1 %v506_v23 }
  0x1f   :  { %461 = vmatprep.subr.bf16.mxu1 %v507_v24  ;;  %p519_p4 = pnand %p518_p3, %p512_p0 }
  0x22   :  { %462 = vmatpush3.bf16.msra.mxu1 %v508_v25 }
  0x23   :  { %463 = vmatprep.subr.bf16.mxu1 %v509_v26 }
  0x26   :  { %464 = vmatpush3.bf16.msra.mxu1 %v510_v27 }
  0x99   :  { %v322_v56 = vpop.permute.xlu0 %321 }
  0x9a   :  { %v327_v57 = vrot.slane %v322_v56, %v44_v30 }
  0xe8   :  { %v130_v35 = vpop.f32.mrb[0].mxu0 }
  0xe9   :  { %v131_v36 = vadd.f32 %v130_v35, %v45_v33  ;;  %v132_v37 = vpop.f32.mrb[1].mxu0 }
  0xea   :  { %v133_v38 = vadd.f32 %v132_v37, %v49_v34  ;;  %v134_v39 = vpop.f32.mrb[2].mxu0 }
  0xeb   :  { %v137_v40 = vmax.f32 %v131_v36, 0.0  ;;  %v135_v41 = vpop.f32.mrb[3].mxu0 }
  0xec   :  { %v138_v42 = vmax.f32 %v133_v38, 0.0 }
  0xed   :  { %v139_v44 = vpack.c.bf16 %v137_v40, %v137_v40 }
  0xee   :  { %v140_v43 = vpack.c.bf16 %v138_v42, %v138_v42 }
  0xf0   :  { %308 = vmatprep.mubr.bf16.mxu1 %v140_v43 }
  0xf1   :  { %309 = vmatmul.mubr.bf16.vlgmr.msra.gmra.mrb[0].mxu1 %v139_v44 }
 0x1c4   :  { %v465_v47 = vpop.f32.mrb[0].mxu1 }
 0x1c5   :  { %v466_v49 = vpop.f32.mrb[1].mxu1 }
 0x1c6   :  { %v467_v50 = vadd.f32 %v466_v49, %v465_v47  ;;  %v468_v51 = vpop.f32.mrb[2].mxu1 }
 0x1c7   :  { %v469_v52 = vpop.f32.mrb[3].mxu1 }
 0x1c8   :  { %v311_v53 = vadd.f32 %v467_v50, %v430_v48 }
 0x1ca   :  { %v316_v54 = vmax.f32 %v311_v53, 0.0 }
 0x1cc   :  { %474 = vmatpush3.xpose.msk.msra.mxu0 %vm328_vm2, %v316_v54 }
 0x1cf   :  { %476 = vmatmul.mubr.msk.f32.vlgmr.msra.gmra.mrb[4].mxu0 %vm328_vm2, %v317_v55 }
 0x2a2   :  { %v401_v58 = vpop.f32.mrb[4].mxu0 }
 0x2a3   :  { %v402_v59 = vadd.f32 %v401_v58, %v327_v57  ;;  %v477_v60 = vpop.f32.mrb[5].mxu0 }
 0x2a5   :  { %406 = vst.msk [vmem:[#allocation3] sm:$0x1] %vm405_vm3, %v402_v59 }
 0x2a6   :  { %522 = shalt.err (!%p519_p4)
}
 0x2a7   :  { %s523_s6 = scalar_lea.hbm %s685_s7, 16 }
 0x2a8   :  { %p524_p5 = scmp.ne.s32.totalorder %s685_s7, %s523_s6  ;;  %p527_p6 = scmp.lt.u32.totalorder %s523_s6, %s685_s7 }
 0x2aa   :  { %p529_p7 = pnand %p527_p6, %p524_p5 }
 0x2ac   :  { %532 = shalt.err (!%p529_p7)
}
 0x2ad   :  { %416 = dma.vmem_to_hbm [thread:$0]  %s414_s8, 16, %s685_s7, [#allocation4]  }
 0x2ae   :  { %533 = dma.done.wait [#allocation4], 16  }
 0x2af   :  { %534 = vsyncadd [#allocation4], 4294967280 }
 0x2b0   :  { %420 = vsyncpa [#allocation4], 1 }

</bundles_post_ra>
